<compile_context>
chip_gen: v7x
topology: tpu7x:2x2x1
jax: 0.10.0
libtpu: 0.0.40
codegen_flags: <defaults>
</compile_context>

<pallas_src>
import functools

import jax
import jax.numpy as jnp
from jax import lax
from jax.experimental import pallas as pl
from jax.experimental.pallas import tpu as pltpu


def _round_up(x: int, m: int) -> int:
    return ((x + m - 1) // m) * m


def _pick_tile(n: int, align: int, max_tile: int) -> int:
    """Largest `align`-aligned tile <= max_tile minimizing padding of n."""
    if n <= max_tile:
        return _round_up(n, align)
    min_pad = (-n) % align            # best achievable with align-aligned tiles
    best_tile, best_pad = align, None
    t = (max_tile // align) * align
    while t >= align:
        pad = (-n) % t
        if best_pad is None or pad < best_pad:
            best_pad, best_tile = pad, t
            if pad == min_pad:        # cannot do better; keep the largest tile
                break
        t -= align
    return best_tile


def _linear_kernel(user_ref, w_ref, b_ref, out_ref):
    # u @ W^T == dot_general contracting dim 1 of u with dim 1 of W (no
    # transpose ahead of the MXU).  Bias [1, F] broadcasts over rows.
    uf = lax.dot_general(
        user_ref[...], w_ref[...],
        dimension_numbers=(((1,), (1,)), ((), ())),
        preferred_element_type=jnp.float32,
    ) + b_ref[...]
    out_ref[...] = uf.astype(out_ref.dtype)


def _score_kernel(uf_ref, item_ref, res_ref):
    # uf @ item^T == dot_general contracting last dims of both operands.
    res = lax.dot_general(
        uf_ref[...], item_ref[...],
        dimension_numbers=(((1,), (1,)), ((), ())),
        preferred_element_type=jnp.float32,
    )
    res_ref[...] = res.astype(res_ref.dtype)


@functools.partial(jax.jit, static_argnames=("tu_max", "ti_max"))
def user_net_forward(user_feat, item_feat, weight, bias, *,
                     tu_max=512, ti_max=2048):
    """user_feat: [U, F], item_feat: [I, F], weight: [F, F], bias: [F].

    Returns (transformed_user_feat [U, F], result [U, I]).
    """
    U, F = user_feat.shape
    I, _ = item_feat.shape
    isz = jnp.dtype(user_feat.dtype).itemsize

    # Tile sizes: rows 8-aligned, item tiles lane-dense (multiple of 128);
    # chosen to minimize padding waste rather than blindly rounding up.
    tu = _pick_tile(U, 8, tu_max)
    ti = _pick_tile(I, 128, ti_max)
    U_pad = _round_up(U, tu)
    I_pad = _round_up(I, ti)

    # Skip padding passes entirely when shapes already line up (static check).
    user_p = user_feat if U_pad == U else jnp.pad(user_feat, ((0, U_pad - U), (0, 0)))
    item_p = item_feat if I_pad == I else jnp.pad(item_feat, ((0, I_pad - I), (0, 0)))
    bias2d = bias.reshape(1, F)

    # ---- Kernel 1: Linear layer (tiny; weight/bias VMEM-resident). ----
    ufeat_p = pl.pallas_call(
        _linear_kernel,
        out_shape=jax.ShapeDtypeStruct((U_pad, F), user_feat.dtype),
        grid=(U_pad // tu,),
        in_specs=[
            pl.BlockSpec((tu, F), lambda i: (i, 0)),   # user row tile
            pl.BlockSpec((F, F), lambda i: (0, 0)),    # weight (VMEM resident)
            pl.BlockSpec((1, F), lambda i: (0, 0)),    # bias   (VMEM resident)
        ],
        out_specs=pl.BlockSpec((tu, F), lambda i: (i, 0)),
        compiler_params=pltpu.CompilerParams(
            dimension_semantics=("parallel",),
            vmem_limit_bytes=32 * 1024 * 1024,
        ),
        cost_estimate=pl.CostEstimate(
            flops=2 * U_pad * F * F,
            transcendentals=0,
            bytes_accessed=isz * (2 * U_pad * F + F * F + F),
        ),
    )(user_p, weight, bias2d)

    # ---- Kernel 2: result = ufeat @ item^T (dominant; both axes parallel). --
    # Double-buffered VMEM footprint for the chosen tiles (+1 MiB headroom).
    vmem_needed = 2 * isz * (tu * ti + ti * F + tu * F) + (1 << 20)
    vmem_limit = max(32 * 1024 * 1024, vmem_needed)

    res_p = pl.pallas_call(
        _score_kernel,
        out_shape=jax.ShapeDtypeStruct((U_pad, I_pad), user_feat.dtype),
        grid=(U_pad // tu, I_pad // ti),
        in_specs=[
            # ufeat tile: block index constant across j -> DMA'd once per row
            # tile (Pallas skips re-fetch of unchanged blocks).
            pl.BlockSpec((tu, F), lambda i, j: (i, 0)),
            pl.BlockSpec((ti, F), lambda i, j: (j, 0)),   # item tile (streamed)
        ],
        # Lane-dense result tile (ti % 128 == 0) -> unmasked vst.
        out_specs=pl.BlockSpec((tu, ti), lambda i, j: (i, j)),
        compiler_params=pltpu.CompilerParams(
            # No output block is resident across a grid axis, so both axes can
            # shard across TensorCores (matters for small-U on v7x).
            dimension_semantics=("parallel", "parallel"),
            vmem_limit_bytes=vmem_limit,
        ),
        cost_estimate=pl.CostEstimate(
            flops=2 * U_pad * I_pad * F,
            transcendentals=0,
            bytes_accessed=isz * (U_pad * F
                                  + (U_pad // tu) * I_pad * F
                                  + U_pad * I_pad),
        ),
    )(ufeat_p, item_p)

    # Skip the slice passes when no padding was introduced (static check).
    ufeat = ufeat_p if U_pad == U else ufeat_p[:U, :]
    result = res_p if (U_pad == U and I_pad == I) else res_p[:U, :I]
    return ufeat, result


if __name__ == "__main__":
    # Small shapes consistent with the module: n_feature=32, 8 users, 8 items.
    n_feature = 32
    n_users = 8
    n_items = 8

    key = jax.random.PRNGKey(0)
    k_u, k_i, k_w, k_b = jax.random.split(key, 4)

    user_feat = jax.random.normal(k_u, (n_users, n_feature), dtype=jnp.float32)
    item_feat = jax.random.normal(k_i, (n_items, n_feature), dtype=jnp.float32)
    # PyTorch-style Linear init: uniform(-1/sqrt(F), 1/sqrt(F)).
    bound = 1.0 / jnp.sqrt(jnp.float32(n_feature))
    weight = jax.random.uniform(k_w, (n_feature, n_feature),
                                minval=-bound, maxval=bound, dtype=jnp.float32)
    bias = jax.random.uniform(k_b, (n_feature,),
                              minval=-bound, maxval=bound, dtype=jnp.float32)

    uf_out, result = user_net_forward(user_feat, item_feat, weight, bias)
    jax.block_until_ready((uf_out, result))

    # Reference check against plain JAX (same math as the PyTorch module).
    uf_ref = user_feat @ weight.T + bias
    res_ref = uf_ref @ item_feat.T
    assert uf_out.shape == uf_ref.shape and result.shape == res_ref.shape
    assert jnp.allclose(uf_out, uf_ref, atol=1e-4, rtol=1e-4)
    assert jnp.allclose(result, res_ref, atol=1e-4, rtol=1e-4)

    print("KERNEL_OK")
</pallas_src>

<mosaic_0001>
module attributes {stable_mosaic.version = 11 : i64} {
  func.func @_score_kernel(%arg0: i32, %arg1: i32, %arg2: memref<8x32xf32, #tpu.memory_space<vmem>>, %arg3: memref<128x32xf32, #tpu.memory_space<vmem>>, %arg4: memref<8x128xf32, #tpu.memory_space<vmem>>) attributes {dimension_semantics = [#tpu.dimension_semantics<parallel>, #tpu.dimension_semantics<parallel>], iteration_bounds = array<i64: 1, 1>, scalar_prefetch = 0 : i64, scratch_operands = 0 : i64, tpu.core_type = #tpu.core_type<tc>, window_params = [{transform_indices = @transform_0, window_bounds = array<i64: 8, 32>}, {transform_indices = @transform_1, window_bounds = array<i64: 128, 32>}, {transform_indices = @transform_2, window_bounds = array<i64: 8, 128>}]} {
    %c0 = arith.constant 0 : index
    %c0_0 = arith.constant 0 : index
    %0 = vector.load %arg2[%c0, %c0_0] : memref<8x32xf32, #tpu.memory_space<vmem>>, vector<8x32xf32>
    %c0_1 = arith.constant 0 : index
    %c0_2 = arith.constant 0 : index
    %1 = vector.load %arg3[%c0_1, %c0_2] : memref<128x32xf32, #tpu.memory_space<vmem>>, vector<128x32xf32>
    %cst = arith.constant dense<0.000000e+00> : vector<8x128xf32>
    %2 = tpu.matmul %0, %1, %cst {dimension_numbers = #tpu.dot_dimension_numbers<[1], [1], [0], [0], [0, 0, 1, 0], [], []>} : vector<8x32xf32>, vector<128x32xf32>, vector<8x128xf32> -> vector<8x128xf32>
    %c0_3 = arith.constant 0 : index
    %c0_4 = arith.constant 0 : index
    %3 = vector.load %arg4[%c0_3, %c0_4] : memref<8x128xf32, #tpu.memory_space<vmem>>, vector<8x128xf32>
    tpu.vector_store %arg4[%c0_3, %c0_4], %2 {strides = array<i32>} : memref<8x128xf32, #tpu.memory_space<vmem>>, vector<8x128xf32>,
    return
  }
  func.func @transform_0(%arg0: i32, %arg1: i32) -> (i32, i32) {
    %c0_i32 = arith.constant 0 : i32
    %c0_i32_0 = arith.constant 0 : i32
    return %arg0, %c0_i32 : i32, i32
  }
  func.func @transform_1(%arg0: i32, %arg1: i32) -> (i32, i32) {
    %c0_i32 = arith.constant 0 : i32
    %c0_i32_0 = arith.constant 0 : i32
    return %arg1, %c0_i32 : i32, i32
  }
  func.func @transform_2(%arg0: i32, %arg1: i32) -> (i32, i32) {
    %c0_i32 = arith.constant 0 : i32
    return %arg0, %arg1 : i32, i32
  }
}

module attributes {stable_mosaic.version = 11 : i64} {
  func.func @_linear_kernel(%arg0: i32, %arg1: memref<8x32xf32, #tpu.memory_space<vmem>>, %arg2: memref<32x32xf32, #tpu.memory_space<vmem>>, %arg3: memref<1x32xf32, #tpu.memory_space<vmem>>, %arg4: memref<8x32xf32, #tpu.memory_space<vmem>>) attributes {dimension_semantics = [#tpu.dimension_semantics<parallel>], iteration_bounds = array<i64: 1>, scalar_prefetch = 0 : i64, scratch_operands = 0 : i64, tpu.core_type = #tpu.core_type<tc>, window_params = [{transform_indices = @transform_0, window_bounds = array<i64: 8, 32>}, {pipeline_mode = #tpu.pipeline_mode<synchronous>, transform_indices = @transform_1, window_bounds = array<i64: 32, 32>}, {pipeline_mode = #tpu.pipeline_mode<synchronous>, transform_indices = @transform_2, window_bounds = array<i64: 1, 32>}, {transform_indices = @transform_3, window_bounds = array<i64: 8, 32>}]} {
    %c0 = arith.constant 0 : index
    %c0_0 = arith.constant 0 : index
    %0 = vector.load %arg1[%c0, %c0_0] : memref<8x32xf32, #tpu.memory_space<vmem>>, vector<8x32xf32>
    %c0_1 = arith.constant 0 : index
    %c0_2 = arith.constant 0 : index
    %1 = vector.load %arg2[%c0_1, %c0_2] : memref<32x32xf32, #tpu.memory_space<vmem>>, vector<32x32xf32>
    %cst = arith.constant dense<0.000000e+00> : vector<8x32xf32>
    %2 = tpu.matmul %0, %1, %cst {dimension_numbers = #tpu.dot_dimension_numbers<[1], [1], [0], [0], [0, 0, 1, 0], [], []>} : vector<8x32xf32>, vector<32x32xf32>, vector<8x32xf32> -> vector<8x32xf32>
    %c0_3 = arith.constant 0 : index
    %c0_4 = arith.constant 0 : index
    %3 = vector.load %arg3[%c0_3, %c0_4] : memref<1x32xf32, #tpu.memory_space<vmem>>, vector<1x32xf32>
    %4 = vector.broadcast %3 : vector<1x32xf32> to vector<8x32xf32>
    %5 = arith.addf %2, %4 : vector<8x32xf32>
    %c0_5 = arith.constant 0 : index
    %c0_6 = arith.constant 0 : index
    %6 = vector.load %arg4[%c0_5, %c0_6] : memref<8x32xf32, #tpu.memory_space<vmem>>, vector<8x32xf32>
    tpu.vector_store %arg4[%c0_5, %c0_6], %5 {strides = array<i32>} : memref<8x32xf32, #tpu.memory_space<vmem>>, vector<8x32xf32>,
    return
  }
  func.func @transform_0(%arg0: i32) -> (i32, i32) {
    %c0_i32 = arith.constant 0 : i32
    %c0_i32_0 = arith.constant 0 : i32
    return %arg0, %c0_i32 : i32, i32
  }
  func.func @transform_1(%arg0: i32) -> (i32, i32) {
    %c0_i32 = arith.constant 0 : i32
    %c0_i32_0 = arith.constant 0 : i32
    %c0_i32_1 = arith.constant 0 : i32
    return %c0_i32, %c0_i32_0 : i32, i32
  }
  func.func @transform_2(%arg0: i32) -> (i32, i32) {
    %c0_i32 = arith.constant 0 : i32
    %c0_i32_0 = arith.constant 0 : i32
    %c0_i32_1 = arith.constant 0 : i32
    return %c0_i32, %c0_i32_0 : i32, i32
  }
  func.func @transform_3(%arg0: i32) -> (i32, i32) {
    %c0_i32 = arith.constant 0 : i32
    %c0_i32_0 = arith.constant 0 : i32
    return %arg0, %c0_i32 : i32, i32
  }
}

</mosaic_0001>

<bundles_post_ra>
// kernel: user_net_forward.3
= control target key start
LH: loop header
LB: loop body
LE: loop exit
PB: predicated region body
PF: predicated region fallthrough
CT: control target
= control target key end

     0   :  { %vm29_vm0 = vcmask 261120   ;;  %v295_v2 = vmov 0.0|0.0   ;;  %vm296_vm2 = vmmov 0   ;;  %v297_v5 = vmov 0.0   ;;  %s400_s0 = inlined_call_operand.vmem [shape: f32[8,32], index: 0, kind: input, shape index: {}]   ;;  %s401_s1 = inlined_call_operand.vmem [shape: f32[128,32], index: 1, kind: input, shape index: {}]   ;;  %s402_s2 = inlined_call_operand.hbm [shape: f32[8,128], index: 2, kind: output, shape index: {}]  }
   0x1   :  { %v13_v0 = vld [vmem:[%s401_s1] sm:$0xff]  ;;  %v14_v1 = vld [vmem:[%s401_s1 + $0x8] sm:$0xff]  ;;  %235 = vmatprep.subr.bf16.mxu0 %v295_v2  ;;  %vm322_vm1 = vmpackc.low %vm29_vm0, %vm29_vm0  ;;  %232 = vmatprep.mubr.msk.f32.mxu0 %vm296_vm2, %v297_v5 }
   0x2   :  { %v236_v3 = vpack.c.bf16 %v14_v1, %v13_v0  ;;  %v15_v6 = vld [vmem:[%s401_s1 + $0x10] sm:$0xff]  ;;  %v16_v7 = vld [vmem:[%s401_s1 + $0x18] sm:$0xff] }
   0x4   :  { %238 = vmatpush3.bf16.xpose.msk.msra.mxu0 %vm322_vm1, %v236_v3 }
   0x5   :  { %239 = vmatprep.subr.bf16.mxu0 %v295_v2 }
   0x6   :  { %7 = vsyncpa [#allocation3], 0  ;;  %v240_v8 = vpack.c.bf16 %v16_v7, %v15_v6  ;;  %v17_v9 = vld [vmem:[%s401_s1 + $0x20] sm:$0xff]  ;;  %v18_v10 = vld [vmem:[%s401_s1 + $0x28] sm:$0xff]  ;;  %s298_s15 = smov [#allocation2]  }
   0x7   :  { %v244_v11 = vpack.c.bf16 %v18_v10, %v17_v9  ;;  %v19_v12 = vld [vmem:[%s401_s1 + $0x30] sm:$0xff]  ;;  %v20_v13 = vld [vmem:[%s401_s1 + $0x38] sm:$0xff]  ;;  %v21_v15 = vld [vmem:[%s401_s1 + $0x40] sm:$0xff]  ;;  %s158_s16 = sshll.u32 %s298_s15, 4  ;;  %s159_s16 = int_to_ptr.vmem [resolvable:$true] %s158_s16 }
   0x8   :  { %v248_v14 = vpack.c.bf16 %v20_v13, %v19_v12  ;;  %v22_v16 = vld [vmem:[%s401_s1 + $0x48] sm:$0xff]  ;;  %v23_v18 = vld [vmem:[%s401_s1 + $0x50] sm:$0xff]  ;;  %v24_v19 = vld [vmem:[%s401_s1 + $0x58] sm:$0xff]  ;;  %s271_s17 = scalar_lea.vmem %s159_s16, 128  ;;  %p276_p1 = scmp.lt.s32.totalorder %s159_s16, %s159_s16 }
   0x9   :  { %v252_v17 = vpack.c.bf16 %v22_v16, %v21_v15  ;;  %v256_v20 = vpack.c.bf16 %v24_v19, %v23_v18  ;;  %v25_v21 = vld [vmem:[%s401_s1 + $0x60] sm:$0xff]  ;;  %v26_v22 = vld [vmem:[%s401_s1 + $0x68] sm:$0xff]  ;;  %v27_v24 = vld [vmem:[%s401_s1 + $0x70] sm:$0xff]  ;;  %p272_p0 = scmp.ne.s32.totalorder %s159_s16, %s271_s17  ;;  %p277_p2 = scmp.lt.s32.totalorder %s271_s17, %s271_s17 }
   0xa   :  { %v260_v23 = vpack.c.bf16 %v26_v22, %v25_v21  ;;  %v28_v25 = vld [vmem:[%s401_s1 + $0x78] sm:$0xff]  ;;  %v12_v27 = vld [vmem:[%s400_s0] sm:$0xff] }
   0xb   :  { %v264_v26 = vpack.c.bf16 %v28_v25, %v27_v24  ;;  %p278_p3 = por %p277_p2, %p276_p1 }
   0xc   :  { %242 = vmatpush3.bf16.xpose.msk.msra.mxu0 %vm322_vm1, %v240_v8 }
   0xd   :  { %243 = vmatprep.subr.bf16.mxu0 %v295_v2  ;;  %p279_p4 = pnand %p278_p3, %p272_p0 }
  0x14   :  { %246 = vmatpush3.bf16.xpose.msk.msra.mxu0 %vm322_vm1, %v244_v11 }
  0x15   :  { %247 = vmatprep.subr.bf16.mxu0 %v295_v2 }
  0x1c   :  { %250 = vmatpush3.bf16.xpose.msk.msra.mxu0 %vm322_vm1, %v248_v14 }
  0x1d   :  { %251 = vmatprep.subr.bf16.mxu0 %v295_v2 }
  0x24   :  { %254 = vmatpush3.bf16.xpose.msk.msra.mxu0 %vm322_vm1, %v252_v17 }
  0x25   :  { %255 = vmatprep.subr.bf16.mxu0 %v295_v2 }
  0x2c   :  { %258 = vmatpush3.bf16.xpose.msk.msra.mxu0 %vm322_vm1, %v256_v20 }
  0x2d   :  { %259 = vmatprep.subr.bf16.mxu0 %v295_v2 }
  0x34   :  { %262 = vmatpush3.bf16.xpose.msk.msra.mxu0 %vm322_vm1, %v260_v23 }
  0x35   :  { %263 = vmatprep.subr.bf16.mxu0 %v295_v2 }
  0x3c   :  { %266 = vmatpush3.bf16.xpose.msk.msra.mxu0 %vm322_vm1, %v264_v26 }
  0x43   :  { %233 = vmatmul.mubr.msk.f32.vlgmr.msra.gmra.mrb[0].mxu0 %vm29_vm0, %v12_v27 }
 0x116   :  { %v147_v28 = vpop.f32.mrb[0].mxu0 }
 0x117   :  { %151 = vst [vmem:[#allocation2] sm:$0xff] %v147_v28  ;;  %v234_v29 = vpop.f32.mrb[1].mxu0 }
 0x118   :  { %282 = shalt.err (!%p279_p4)
}
 0x119   :  { %s283_s19 = scalar_lea.hbm %s402_s2, 128 }
 0x11a   :  { %p284_p5 = scmp.ne.s32.totalorder %s402_s2, %s283_s19  ;;  %p287_p6 = scmp.lt.u32.totalorder %s283_s19, %s402_s2 }
 0x11c   :  { %p289_p7 = pnand %p287_p6, %p284_p5 }
 0x11e   :  { %292 = shalt.err (!%p289_p7)
}
 0x11f   :  { %161 = dma.vmem_to_hbm [thread:$0]  %s159_s16, 128, %s402_s2, [#allocation3]  }
 0x120   :  { %293 = dma.done.wait [#allocation3], 128  }
 0x121   :  { %294 = vsyncadd [#allocation3], 4294967168 }
 0x122   :  { %165 = vsyncpa [#allocation3], 1 }

// kernel: user_net_forward.2
= control target key start
LH: loop header
LB: loop body
LE: loop exit
PB: predicated region body
PF: predicated region fallthrough
CT: control target
= control target key end

     0   :  { %8 = vsyncpa [#allocation3], 0  ;;  %s298_s0 = inlined_call_operand.hbm [shape: f32[8,32], index: 0, kind: input, shape index: {}]   ;;  %s299_s1 = inlined_call_operand.hbm [shape: f32[32,32], index: 1, kind: input, shape index: {}]   ;;  %s300_s2 = inlined_call_operand.vmem [shape: f32[1,32], index: 2, kind: input, shape index: {}]   ;;  %s301_s3 = inlined_call_operand.vmem [shape: f32[8,32], index: 3, kind: output, shape index: {}]  }
   0x1   :  { %9 = vsyncpa [#allocation5], 0  ;;  %s230_s12 = smov [#allocation2]   ;;  %s231_s14 = smov [#allocation4]  }
   0x2   :  { %s16_s13 = sshll.u32 %s230_s12, 4  ;;  %s25_s15 = sshll.u32 %s231_s14, 4  ;;  %s17_s13 = int_to_ptr.vmem [resolvable:$true] %s16_s13  ;;  %s257_s15 = int_to_ptr.vmem [resolvable:$true] %s25_s15 }
   0x3   :  { %s182_s18 = scalar_lea.hbm %s298_s0, 128 }
   0x4   :  { %p183_p0 = scmp.ne.s32.totalorder %s298_s0, %s182_s18  ;;  %p186_p1 = scmp.lt.u32.totalorder %s182_s18, %s298_s0 }
   0x6   :  { %p188_p2 = pnand %p186_p1, %p183_p0 }
   0x8   :  { %191 = shalt.err (!%p188_p2)
}
   0x9   :  { %s192_s23 = scalar_lea.vmem %s17_s13, 128  ;;  %p197_p4 = scmp.lt.s32.totalorder %s17_s13, %s17_s13 }
   0xa   :  { %p193_p3 = scmp.ne.s32.totalorder %s17_s13, %s192_s23  ;;  %p198_p5 = scmp.lt.s32.totalorder %s192_s23, %s192_s23 }
   0xc   :  { %p199_p6 = por %p198_p5, %p197_p4 }
   0xe   :  { %p200_p7 = pnand %p199_p6, %p193_p3 }
  0x10   :  { %203 = shalt.err (!%p200_p7)
}
  0x11   :  { %19 = dma.hbm_to_vmem [thread:$0]  %s298_s0, 128, %s17_s13, [#allocation3]  }
  0x12   :  { %s204_s28 = scalar_lea.hbm %s299_s1, 512 }
  0x13   :  { %p205_p8 = scmp.ne.s32.totalorder %s299_s1, %s204_s28  ;;  %p208_p9 = scmp.lt.u32.totalorder %s204_s28, %s299_s1 }
  0x15   :  { %p210_p10 = pnand %p208_p9, %p205_p8 }
  0x17   :  { %213 = shalt.err (!%p210_p10)
}
  0x18   :  { %s214_s6 = scalar_lea.vmem %s257_s15, 512  ;;  %p219_p12 = scmp.lt.s32.totalorder %s257_s15, %s257_s15 }
  0x19   :  { %p215_p11 = scmp.ne.s32.totalorder %s257_s15, %s214_s6  ;;  %p220_p13 = scmp.lt.s32.totalorder %s214_s6, %s214_s6 }
  0x1b   :  { %p221_p0 = por %p220_p13, %p219_p12 }
  0x1d   :  { %p222_p1 = pnand %p221_p0, %p215_p11 }
  0x1f   :  { %225 = shalt.err (!%p222_p1)
}
  0x20   :  { %s232_s0 = smov 128   ;;  %s233_s7 = smov 8  }
  0x21   :  { %31 = dma.hbm_to_vmem [thread:$0]  %s299_s1, 512, %s257_s15, [#allocation5], %s232_s0, %s232_s0, %s233_s7  }
  0x22   :  { %226 = dma.done.wait [#allocation3], 128  }
  0x23   :  { %227 = vsyncadd [#allocation3], 4294967168 }
  0x24   :  { %228 = dma.done.wait [#allocation5], 512  }
  0x25   :  { %229 = vsyncadd [#allocation5], 4294966784  ;;  %v234_v0 = vmov 0.0|0.0   ;;  %vm235_vm0 = vmmov 0   ;;  %v236_v1 = vmov 0.0   ;;  %vm52_vm1 = vcmask 261120  }
  0x26   :  { %167 = vmatprep.subr.bf16.mxu0 %v234_v0  ;;  %164 = vmatprep.mubr.msk.f32.mxu0 %vm235_vm0, %v236_v1  ;;  %v41_v2 = vld [vmem:[#allocation4] sm:$0xff]  ;;  %v42_v3 = vld [vmem:[#allocation4 + $0x8] sm:$0xff]  ;;  %vm169_vm2 = vmpackc.low %vm52_vm1, %vm52_vm1 }
  0x27   :  { %v168_v4 = vpack.c.bf16 %v42_v3, %v41_v2  ;;  %v43_v5 = vld [vmem:[#allocation4 + $0x10] sm:$0xff]  ;;  %v44_v6 = vld [vmem:[#allocation4 + $0x18] sm:$0xff] }
  0x28   :  { %v172_v7 = vpack.c.bf16 %v44_v6, %v43_v5  ;;  %v40_v8 = vld [vmem:[#allocation2] sm:$0xff] }
  0x29   :  { %170 = vmatpush3.bf16.xpose.msk.msra.mxu0 %vm169_vm2, %v168_v4  ;;  %v145_v9 = vld [vmem:[%s300_s2] ss:$0 sm:$0xff] }
  0x2a   :  { %171 = vmatprep.subr.bf16.mxu0 %v234_v0 }
  0x31   :  { %174 = vmatpush3.bf16.xpose.msk.msra.mxu0 %vm169_vm2, %v172_v7 }
  0x38   :  { %165 = vmatmul.mubr.msk.f32.vlgmr.msra.gmra.mrb[0].mxu0 %vm52_vm1, %v40_v8 }
 0x10b   :  { %v134_v10 = vpop.f32.mrb[0].mxu0 }
 0x10c   :  { %v135_v11 = vadd.f32 %v145_v9, %v134_v10  ;;  %v166_v12 = vpop.f32.mrb[1].mxu0 }
 0x10e   :  { %138 = vst.msk [vmem:[%s301_s3] sm:$0xff] %vm52_vm1, %v135_v11 }
 0x10f   :  { %143 = vsyncpa [#allocation3], 1 }
 0x110   :  { %144 = vsyncpa [#allocation5], 1 }

</bundles_post_ra>
